<compile_context>
chip_gen: v7x
topology: tpu7x:2x2x1
jax: 0.10.0
libtpu: 0.0.40
codegen_flags: <defaults>
</compile_context>

<pallas_src>
import jax
import jax.numpy as jnp
import numpy as np
from jax.experimental import pallas as pl
from jax.experimental.pallas import tpu as pltpu

LN_EPS = 1e-5
LANE = 128
SUBLANE = 8


def _round_up(x, m):
    return (x + m - 1) // m * m


def _vmem_capacity():
    """Physical VMEM per TensorCore, with a conservative fallback (v7x)."""
    try:
        info = pltpu.get_tpu_info()
        for attr in ("vmem_capacity_bytes", "vmem_size_bytes", "vmem_bytes"):
            cap = getattr(info, attr, None)
            if cap:
                return int(cap)
    except Exception:
        pass
    return 64 << 20


def _pick_tm(B, batch_tile):
    """Batch tile: >=2 grid steps when possible (v7x megacore), nearly-full
    last tile, sublane-aligned."""
    if B <= SUBLANE:
        return B                       # single full-extent block
    n_tiles = -(-B // batch_tile)
    if n_tiles < 2:
        n_tiles = 2                    # keep both TensorCores busy on v7x
    tm = _round_up(-(-B // n_tiles), SUBLANE)
    return max(SUBLANE, min(tm, _round_up(B, SUBLANE)))


# ----------------------------------------------------------------------------
# Kernel
# ----------------------------------------------------------------------------
def _make_reduce_kernel(with_e: bool, hidden: int, hp: int):
    def kernel(*refs):
        if with_e:
            (hl_ref, hr_ref, cl_ref, cr_ref, e_ref,
             al_ref, blv_ref, ar_ref, brv_ref,
             wl_ref, wr_ref, we_ref, bias_ref, h_ref, c_ref) = refs
        else:
            (hl_ref, hr_ref, cl_ref, cr_ref,
             al_ref, blv_ref, ar_ref, brv_ref,
             wl_ref, wr_ref, bias_ref, h_ref, c_ref) = refs

        wdt = wl_ref.dtype

        # Hoisted-global-stats LayerNorm -> pure per-feature affine (VPU),
        # cast per-stream to the MXU dtype (no lane-concat temporary).
        xl = (hl_ref[...] * al_ref[...] + blv_ref[...]).astype(wdt)
        xr = (hr_ref[...] * ar_ref[...] + brv_ref[...]).astype(wdt)

        # Three accumulated MXU dots with f32 accumulation.
        gates = jnp.dot(xl, wl_ref[...], preferred_element_type=jnp.float32)
        gates = gates + jnp.dot(xr, wr_ref[...],
                                preferred_element_type=jnp.float32)
        if with_e:
            gates = gates + jnp.dot(e_ref[...].astype(wdt), we_ref[...],
                                    preferred_element_type=jnp.float32)
        gates = gates + bias_ref[...]

        # Gate blocks start at 128-aligned offsets k*hp; only the first
        # `hidden` columns of each block are meaningful.
        gi = gates[:, 0 * hp:0 * hp + hidden]
        gfl = gates[:, 1 * hp:1 * hp + hidden]
        gfr = gates[:, 2 * hp:2 * hp + hidden]
        go = gates[:, 3 * hp:3 * hp + hidden]
        gg = gates[:, 4 * hp:4 * hp + hidden]

        sig = jax.nn.sigmoid
        c = (cl_ref[...] * sig(gfl) + cr_ref[...] * sig(gfr)
             + sig(gi) * jnp.tanh(gg))
        h = sig(go) * jnp.tanh(c)

        h_ref[...] = h
        c_ref[...] = c

    return kernel


# ----------------------------------------------------------------------------
# Parameter packing (done once; weights stay packed)
# ----------------------------------------------------------------------------
def pack_params(params, hidden_size, with_e, weight_dtype=jnp.bfloat16):
    """Per stream: W (5H, H) torch layout -> (H, 5*Hp) with each gate's output
    columns zero-padded to Hp = round_up(H, 128).  Bias -> (1, 5*Hp)."""
    H = hidden_size
    Hp = _round_up(H, LANE)

    def pack_w(w_raw):
        wt = jnp.transpose(w_raw)                       # (H, 5H): y = x @ W.T
        wt = wt.reshape(H, 5, H)                        # gate-major split
        wt = jnp.pad(wt, ((0, 0), (0, 0), (0, Hp - H)))
        return wt.reshape(H, 5 * Hp).astype(weight_dtype)

    packed = {
        "wl": pack_w(params["wl"]),
        "wr": pack_w(params["wr"]),
        "Hp": Hp,
        "with_e": with_e,
        "wdtype": weight_dtype,
    }
    if with_e:
        packed["we"] = pack_w(params["we"])

    bias = params["bl"].reshape(5, H)
    bias = jnp.pad(bias, ((0, 0), (0, Hp - H))).reshape(1, 5 * Hp)
    packed["bias"] = bias.astype(jnp.float32)
    return packed


# ----------------------------------------------------------------------------
# Forward wrapper
# ----------------------------------------------------------------------------
def _ln_affine(z, a, b):
    """Single-pass global LayerNorm stats (torch.mean / unbiased torch.std over
    ALL elements) folded into an equivalent per-feature scale/shift."""
    n = z.size
    zf = z.astype(jnp.float32)
    s1 = jnp.sum(zf)
    s2 = jnp.sum(zf * zf)
    mu = s1 / n
    var = (s2 - n * mu * mu) / (n - 1)           # unbiased; fine for O(1) data
    sigma = jnp.sqrt(jnp.maximum(var, 0.0))
    scale = a / (sigma + LN_EPS)                 # (1, H)
    shift = b - mu * scale                       # (1, H)
    return scale, shift


def reduce_forward(sl, sr, params, packed=None, e=None, batch_tile=512):
    """Pallas version of Reduce.forward. sl=(hl,cl), sr=(hr,cr), each (B,H).
    Returns full (B,H) h and c (use split_rows for torch.split parity)."""
    hl, cl = sl
    hr, cr = sr
    B, H = hl.shape
    with_e = e is not None
    if packed is None:
        packed = pack_params(params, H, with_e)
    if with_e and "we" not in packed:
        raise ValueError("packed params missing 'we' for e input")
    Hp = packed["Hp"]

    # Hoisted global LN statistics (exact torch semantics), single pass.
    al, blv = _ln_affine(hl, params["a_left"], params["b_left"])
    ar, brv = _ln_affine(hr, params["a_right"], params["b_right"])

    tm = _pick_tm(B, batch_tile)
    grid = (pl.cdiv(B, tm),)

    act_spec = pl.BlockSpec((tm, H), lambda i: (i, 0))
    out_spec = pl.BlockSpec((tm, H), lambda i: (i, 0))
    resident = pl.BlockSpec(memory_space=pltpu.MemorySpace.VMEM)

    acts = [hl, hr, cl, cr] + ([e] if with_e else [])
    vecs = [al, blv, ar, brv]
    weights = [packed["wl"], packed["wr"]] + ([packed["we"]] if with_e else [])

    in_specs = ([act_spec] * len(acts)
                + [resident] * len(vecs)
                + [resident] * len(weights)
                + [resident])                       # bias

    # VMEM budget: single-buffered residents + double-buffered act/out tiles.
    w_bytes = sum(int(w.size) * w.dtype.itemsize for w in weights)
    vec_bytes = (4 * 8 * Hp + 8 * 5 * Hp) * 4
    pipe_bytes = (len(acts) + 2) * 2 * tm * _round_up(H, LANE) * 4
    temp_bytes = 4 * tm * 5 * Hp * 4
    need = int(w_bytes + vec_bytes + pipe_bytes + temp_bytes + (2 << 20))
    cap = _vmem_capacity()
    vmem_limit = int(max(min(need, cap - (8 << 20)), 16 << 20))
    # TODO(synk): for very large H where the packed weights alone exceed the
    # VMEM budget, add a second grid axis over the gate/output dim so only an
    # (H, tn) weight slab is resident at a time.

    h, c = pl.pallas_call(
        _make_reduce_kernel(with_e, H, Hp),
        out_shape=(jax.ShapeDtypeStruct((B, H), jnp.float32),
                   jax.ShapeDtypeStruct((B, H), jnp.float32)),
        grid=grid,
        in_specs=in_specs,
        out_specs=(out_spec, out_spec),
        compiler_params=pltpu.CompilerParams(
            dimension_semantics=("parallel",),
            vmem_limit_bytes=vmem_limit),
    )(*acts, *vecs, *weights, packed["bias"])

    return h, c


def split_rows(x):
    """Reproduce torch.split(x, 1) -> tuple of (1, H) rows (consumer-side)."""
    return tuple(x[i:i + 1] for i in range(x.shape[0]))


# ----------------------------------------------------------------------------
# Parameters / reference
# ----------------------------------------------------------------------------
def make_params(hidden_size, key):
    """Deterministic synthetic parameters matching the PyTorch module shapes."""
    H = hidden_size
    k_wl, k_wr, k_we, k_bl = jax.random.split(key, 4)
    # HeKaimingInitializer: normal, scale = sqrt(4 / (5H + H)), weight (5H, H).
    scale = np.sqrt(4.0 / (5 * H + H)).astype(np.float32)

    def he(k):
        return scale * jax.random.normal(k, (5 * H, H), dtype=jnp.float32)

    return dict(
        wl=he(k_wl),                                          # (5H, H)
        wr=he(k_wr),                                          # (5H, H)
        we=he(k_we),                                          # (5H, H)
        bl=0.1 * jax.random.normal(k_bl, (5 * H,), dtype=jnp.float32),
        a_left=jnp.ones((1, H), jnp.float32),
        b_left=jnp.zeros((1, H), jnp.float32),
        a_right=jnp.ones((1, H), jnp.float32),
        b_right=jnp.zeros((1, H), jnp.float32),
    )


def reduce_reference(sl, sr, params, e=None):
    """Pure-JAX reference mirroring the PyTorch forward exactly."""
    hl, cl = sl
    hr, cr = sr
    H = hl.shape[1]

    def ln(z, a, b):
        n = z.size
        mu = jnp.mean(z)
        sigma = jnp.sqrt(jnp.sum((z - mu) ** 2) / (n - 1))
        return (z - mu) / (sigma + LN_EPS) * a + b

    xl = ln(hl, params["a_left"], params["b_left"])
    xr = ln(hr, params["a_right"], params["b_right"])
    gates = xl @ params["wl"].T + xr @ params["wr"].T + params["bl"][None, :]
    if e is not None:
        gates = gates + e @ params["we"].T
    gi, gfl, gfr, go, gg = [gates[:, k * H:(k + 1) * H] for k in range(5)]
    sig = jax.nn.sigmoid
    c = cl * sig(gfl) + cr * sig(gfr) + sig(gi) * jnp.tanh(gg)
    h = sig(go) * jnp.tanh(c)
    return h, c


# ----------------------------------------------------------------------------
# Self-test
# ----------------------------------------------------------------------------
if __name__ == "__main__":
    key = jax.random.PRNGKey(0)
    k_hl, k_cl, k_hr, k_cr, k_e, k_p, k_big = jax.random.split(key, 7)

    B, H = 2, 32
    hl = jax.random.normal(k_hl, (B, H), dtype=jnp.float32)
    cl = jax.random.normal(k_cl, (B, H), dtype=jnp.float32)
    hr = jax.random.normal(k_hr, (B, H), dtype=jnp.float32)
    cr = jax.random.normal(k_cr, (B, H), dtype=jnp.float32)
    e = jax.random.normal(k_e, (B, H), dtype=jnp.float32)

    params = make_params(H, k_p)

    # Exact-precision (f32 weights) packing — tight check.
    packed2_f32 = pack_params(params, H, with_e=False, weight_dtype=jnp.float32)
    packed3_f32 = pack_params(params, H, with_e=True, weight_dtype=jnp.float32)
    # Default bf16 (MXU-native) packing — loose check.
    packed3_bf16 = pack_params(params, H, with_e=True)

    h0, c0 = reduce_forward((hl, cl), (hr, cr), params, packed2_f32, e=None)
    h1, c1 = reduce_forward((hl, cl), (hr, cr), params, packed3_f32, e=e)
    hb16, cb16 = reduce_forward((hl, cl), (hr, cr), params, packed3_bf16, e=e)
    jax.block_until_ready((h0, c0, h1, c1, hb16, cb16))

    h_ref0, c_ref0 = reduce_reference((hl, cl), (hr, cr), params, e=None)
    h_ref1, c_ref1 = reduce_reference((hl, cl), (hr, cr), params, e=e)
    np.testing.assert_allclose(np.asarray(h0), np.asarray(h_ref0), rtol=1e-4, atol=1e-4)
    np.testing.assert_allclose(np.asarray(c0), np.asarray(c_ref0), rtol=1e-4, atol=1e-4)
    np.testing.assert_allclose(np.asarray(h1), np.asarray(h_ref1), rtol=1e-4, atol=1e-4)
    np.testing.assert_allclose(np.asarray(c1), np.asarray(c_ref1), rtol=1e-4, atol=1e-4)
    np.testing.assert_allclose(np.asarray(hb16), np.asarray(h_ref1), rtol=5e-2, atol=5e-2)
    np.testing.assert_allclose(np.asarray(cb16), np.asarray(c_ref1), rtol=5e-2, atol=5e-2)

    # API-parity split (deferred, outside the kernel).
    h_rows = split_rows(h1)
    assert h_rows[0].shape == (1, H)

    # Larger, non-divisible batch: exercises >=2 grid steps and the ragged
    # (masked) last tile — no wrapper padding copies anywhere.
    BB = 20
    kb = jax.random.split(k_big, 5)
    bhl, bcl, bhr, bcr, be = [jax.random.normal(kk, (BB, H), dtype=jnp.float32)
                              for kk in kb]
    packed3b_f32 = pack_params(params, H, with_e=True, weight_dtype=jnp.float32)
    hbig, cbig = reduce_forward((bhl, bcl), (bhr, bcr), params, packed3b_f32,
                                e=be, batch_tile=512)
    jax.block_until_ready((hbig, cbig))
    hbig_ref, cbig_ref = reduce_reference((bhl, bcl), (bhr, bcr), params, e=be)
    np.testing.assert_allclose(np.asarray(hbig), np.asarray(hbig_ref), rtol=1e-4, atol=1e-4)
    np.testing.assert_allclose(np.asarray(cbig), np.asarray(cbig_ref), rtol=1e-4, atol=1e-4)

    print("KERNEL_OK")
</pallas_src>

<mosaic_0001>
module attributes {stable_mosaic.version = 11 : i64} {
  func.func @kernel(%arg0: i32, %arg1: memref<2x32xf32, #tpu.memory_space<vmem>>, %arg2: memref<2x32xf32, #tpu.memory_space<vmem>>, %arg3: memref<2x32xf32, #tpu.memory_space<vmem>>, %arg4: memref<2x32xf32, #tpu.memory_space<vmem>>, %arg5: memref<1x32xf32, #tpu.memory_space<vmem>>, %arg6: memref<1x32xf32, #tpu.memory_space<vmem>>, %arg7: memref<1x32xf32, #tpu.memory_space<vmem>>, %arg8: memref<1x32xf32, #tpu.memory_space<vmem>>, %arg9: memref<32x640xf32, #tpu.memory_space<vmem>>, %arg10: memref<32x640xf32, #tpu.memory_space<vmem>>, %arg11: memref<1x640xf32, #tpu.memory_space<vmem>>, %arg12: memref<2x32xf32, #tpu.memory_space<vmem>>, %arg13: memref<2x32xf32, #tpu.memory_space<vmem>>) attributes {dimension_semantics = [#tpu.dimension_semantics<parallel>], iteration_bounds = array<i64: 1>, scalar_prefetch = 0 : i64, scratch_operands = 0 : i64, tpu.core_type = #tpu.core_type<tc>, window_params = [{transform_indices = @transform_0, window_bounds = array<i64: 2, 32>}, {transform_indices = @transform_1, window_bounds = array<i64: 2, 32>}, {transform_indices = @transform_2, window_bounds = array<i64: 2, 32>}, {transform_indices = @transform_3, window_bounds = array<i64: 2, 32>}, {pipeline_mode = #tpu.pipeline_mode<synchronous>, transform_indices = @transform_4, window_bounds = array<i64: 1, 32>}, {pipeline_mode = #tpu.pipeline_mode<synchronous>, transform_indices = @transform_5, window_bounds = array<i64: 1, 32>}, {pipeline_mode = #tpu.pipeline_mode<synchronous>, transform_indices = @transform_6, window_bounds = array<i64: 1, 32>}, {pipeline_mode = #tpu.pipeline_mode<synchronous>, transform_indices = @transform_7, window_bounds = array<i64: 1, 32>}, {pipeline_mode = #tpu.pipeline_mode<synchronous>, transform_indices = @transform_8, window_bounds = array<i64: 32, 640>}, {pipeline_mode = #tpu.pipeline_mode<synchronous>, transform_indices = @transform_9, window_bounds = array<i64: 32, 640>}, {pipeline_mode = #tpu.pipeline_mode<synchronous>, transform_indices = @transform_10, window_bounds = array<i64: 1, 640>}, {transform_indices = @transform_11, window_bounds = array<i64: 2, 32>}, {transform_indices = @transform_12, window_bounds = array<i64: 2, 32>}]} {
    %c0 = arith.constant 0 : index
    %c0_0 = arith.constant 0 : index
    %0 = vector.load %arg1[%c0, %c0_0] : memref<2x32xf32, #tpu.memory_space<vmem>>, vector<2x32xf32>
    %c0_1 = arith.constant 0 : index
    %c0_2 = arith.constant 0 : index
    %1 = vector.load %arg5[%c0_1, %c0_2] : memref<1x32xf32, #tpu.memory_space<vmem>>, vector<1x32xf32>
    %2 = vector.broadcast %1 : vector<1x32xf32> to vector<2x32xf32>
    %3 = arith.mulf %0, %2 : vector<2x32xf32>
    %c0_3 = arith.constant 0 : index
    %c0_4 = arith.constant 0 : index
    %4 = vector.load %arg6[%c0_3, %c0_4] : memref<1x32xf32, #tpu.memory_space<vmem>>, vector<1x32xf32>
    %5 = vector.broadcast %4 : vector<1x32xf32> to vector<2x32xf32>
    %6 = arith.addf %3, %5 : vector<2x32xf32>
    %c0_5 = arith.constant 0 : index
    %c0_6 = arith.constant 0 : index
    %7 = vector.load %arg2[%c0_5, %c0_6] : memref<2x32xf32, #tpu.memory_space<vmem>>, vector<2x32xf32>
    %c0_7 = arith.constant 0 : index
    %c0_8 = arith.constant 0 : index
    %8 = vector.load %arg7[%c0_7, %c0_8] : memref<1x32xf32, #tpu.memory_space<vmem>>, vector<1x32xf32>
    %9 = vector.broadcast %8 : vector<1x32xf32> to vector<2x32xf32>
    %10 = arith.mulf %7, %9 : vector<2x32xf32>
    %c0_9 = arith.constant 0 : index
    %c0_10 = arith.constant 0 : index
    %11 = vector.load %arg8[%c0_9, %c0_10] : memref<1x32xf32, #tpu.memory_space<vmem>>, vector<1x32xf32>
    %12 = vector.broadcast %11 : vector<1x32xf32> to vector<2x32xf32>
    %13 = arith.addf %10, %12 : vector<2x32xf32>
    %c0_11 = arith.constant 0 : index
    %c0_12 = arith.constant 0 : index
    %14 = vector.load %arg9[%c0_11, %c0_12] : memref<32x640xf32, #tpu.memory_space<vmem>>, vector<32x640xf32>
    %cst = arith.constant dense<0.000000e+00> : vector<2x640xf32>
    %15 = tpu.matmul %6, %14, %cst {dimension_numbers = #tpu.dot_dimension_numbers<[1], [0], [0], [1], [0, 0, 1, 1], [], []>} : vector<2x32xf32>, vector<32x640xf32>, vector<2x640xf32> -> vector<2x640xf32>
    %c0_13 = arith.constant 0 : index
    %c0_14 = arith.constant 0 : index
    %16 = vector.load %arg10[%c0_13, %c0_14] : memref<32x640xf32, #tpu.memory_space<vmem>>, vector<32x640xf32>
    %cst_15 = arith.constant dense<0.000000e+00> : vector<2x640xf32>
    %17 = tpu.matmul %13, %16, %cst_15 {dimension_numbers = #tpu.dot_dimension_numbers<[1], [0], [0], [1], [0, 0, 1, 1], [], []>} : vector<2x32xf32>, vector<32x640xf32>, vector<2x640xf32> -> vector<2x640xf32>
    %18 = arith.addf %15, %17 : vector<2x640xf32>
    %c0_16 = arith.constant 0 : index
    %c0_17 = arith.constant 0 : index
    %19 = vector.load %arg11[%c0_16, %c0_17] : memref<1x640xf32, #tpu.memory_space<vmem>>, vector<1x640xf32>
    %20 = vector.broadcast %19 : vector<1x640xf32> to vector<2x640xf32>
    %21 = arith.addf %18, %20 : vector<2x640xf32>
    %22 = vector.extract_strided_slice %21 {offsets = [0, 0], sizes = [2, 32], strides = [1, 1]} : vector<2x640xf32> to vector<2x32xf32>
    %23 = vector.extract_strided_slice %21 {offsets = [0, 128], sizes = [2, 32], strides = [1, 1]} : vector<2x640xf32> to vector<2x32xf32>
    %24 = vector.extract_strided_slice %21 {offsets = [0, 256], sizes = [2, 32], strides = [1, 1]} : vector<2x640xf32> to vector<2x32xf32>
    %25 = vector.extract_strided_slice %21 {offsets = [0, 384], sizes = [2, 32], strides = [1, 1]} : vector<2x640xf32> to vector<2x32xf32>
    %26 = vector.extract_strided_slice %21 {offsets = [0, 512], sizes = [2, 32], strides = [1, 1]} : vector<2x640xf32> to vector<2x32xf32>
    %c0_18 = arith.constant 0 : index
    %c0_19 = arith.constant 0 : index
    %27 = vector.load %arg3[%c0_18, %c0_19] : memref<2x32xf32, #tpu.memory_space<vmem>>, vector<2x32xf32>
    %28 = arith.negf %23 : vector<2x32xf32>
    %29 = math.exp %28 : vector<2x32xf32>
    %cst_20 = arith.constant 1.000000e+00 : f32
    %30 = vector.broadcast %cst_20 : f32 to vector<2x32xf32>
    %31 = arith.addf %30, %29 : vector<2x32xf32>
    %32 = arith.divf %30, %31 : vector<2x32xf32>
    %33 = arith.mulf %27, %32 : vector<2x32xf32>
    %c0_21 = arith.constant 0 : index
    %c0_22 = arith.constant 0 : index
    %34 = vector.load %arg4[%c0_21, %c0_22] : memref<2x32xf32, #tpu.memory_space<vmem>>, vector<2x32xf32>
    %35 = arith.negf %24 : vector<2x32xf32>
    %36 = math.exp %35 : vector<2x32xf32>
    %cst_23 = arith.constant 1.000000e+00 : f32
    %37 = vector.broadcast %cst_23 : f32 to vector<2x32xf32>
    %38 = arith.addf %37, %36 : vector<2x32xf32>
    %39 = arith.divf %37, %38 : vector<2x32xf32>
    %40 = arith.mulf %34, %39 : vector<2x32xf32>
    %41 = arith.addf %33, %40 : vector<2x32xf32>
    %42 = arith.negf %22 : vector<2x32xf32>
    %43 = math.exp %42 : vector<2x32xf32>
    %cst_24 = arith.constant 1.000000e+00 : f32
    %44 = vector.broadcast %cst_24 : f32 to vector<2x32xf32>
    %45 = arith.addf %44, %43 : vector<2x32xf32>
    %46 = arith.divf %44, %45 : vector<2x32xf32>
    %47 = math.tanh %26 : vector<2x32xf32>
    %48 = arith.mulf %46, %47 : vector<2x32xf32>
    %49 = arith.addf %41, %48 : vector<2x32xf32>
    %50 = arith.negf %25 : vector<2x32xf32>
    %51 = math.exp %50 : vector<2x32xf32>
    %cst_25 = arith.constant 1.000000e+00 : f32
    %52 = vector.broadcast %cst_25 : f32 to vector<2x32xf32>
    %53 = arith.addf %52, %51 : vector<2x32xf32>
    %54 = arith.divf %52, %53 : vector<2x32xf32>
    %55 = math.tanh %49 : vector<2x32xf32>
    %56 = arith.mulf %54, %55 : vector<2x32xf32>
    %c0_26 = arith.constant 0 : index
    %c0_27 = arith.constant 0 : index
    %57 = vector.load %arg12[%c0_26, %c0_27] : memref<2x32xf32, #tpu.memory_space<vmem>>, vector<2x32xf32>
    tpu.vector_store %arg12[%c0_26, %c0_27], %56 {strides = array<i32>} : memref<2x32xf32, #tpu.memory_space<vmem>>, vector<2x32xf32>,
    %c0_28 = arith.constant 0 : index
    %c0_29 = arith.constant 0 : index
    %58 = vector.load %arg13[%c0_28, %c0_29] : memref<2x32xf32, #tpu.memory_space<vmem>>, vector<2x32xf32>
    tpu.vector_store %arg13[%c0_28, %c0_29], %49 {strides = array<i32>} : memref<2x32xf32, #tpu.memory_space<vmem>>, vector<2x32xf32>,
    return
  }
  func.func @transform_0(%arg0: i32) -> (i32, i32) {
    %c0_i32 = arith.constant 0 : i32
    %c0_i32_0 = arith.constant 0 : i32
    return %arg0, %c0_i32 : i32, i32
  }
  func.func @transform_1(%arg0: i32) -> (i32, i32) {
    %c0_i32 = arith.constant 0 : i32
    %c0_i32_0 = arith.constant 0 : i32
    return %arg0, %c0_i32 : i32, i32
  }
  func.func @transform_2(%arg0: i32) -> (i32, i32) {
    %c0_i32 = arith.constant 0 : i32
    %c0_i32_0 = arith.constant 0 : i32
    return %arg0, %c0_i32 : i32, i32
  }
  func.func @transform_3(%arg0: i32) -> (i32, i32) {
    %c0_i32 = arith.constant 0 : i32
    %c0_i32_0 = arith.constant 0 : i32
    return %arg0, %c0_i32 : i32, i32
  }
  func.func @transform_4(%arg0: i32) -> (i32, i32) {
    %c0_i32 = arith.constant 0 : i32
    %c0_i32_0 = arith.constant 0 : i32
    %c0_i32_1 = arith.constant 0 : i32
    return %c0_i32, %c0_i32_0 : i32, i32
  }
  func.func @transform_5(%arg0: i32) -> (i32, i32) {
    %c0_i32 = arith.constant 0 : i32
    %c0_i32_0 = arith.constant 0 : i32
    %c0_i32_1 = arith.constant 0 : i32
    return %c0_i32, %c0_i32_0 : i32, i32
  }
  func.func @transform_6(%arg0: i32) -> (i32, i32) {
    %c0_i32 = arith.constant 0 : i32
    %c0_i32_0 = arith.constant 0 : i32
    %c0_i32_1 = arith.constant 0 : i32
    return %c0_i32, %c0_i32_0 : i32, i32
  }
  func.func @transform_7(%arg0: i32) -> (i32, i32) {
    %c0_i32 = arith.constant 0 : i32
    %c0_i32_0 = arith.constant 0 : i32
    %c0_i32_1 = arith.constant 0 : i32
    return %c0_i32, %c0_i32_0 : i32, i32
  }
  func.func @transform_8(%arg0: i32) -> (i32, i32) {
    %c0_i32 = arith.constant 0 : i32
    %c0_i32_0 = arith.constant 0 : i32
    %c0_i32_1 = arith.constant 0 : i32
    return %c0_i32, %c0_i32_0 : i32, i32
  }
  func.func @transform_9(%arg0: i32) -> (i32, i32) {
    %c0_i32 = arith.constant 0 : i32
    %c0_i32_0 = arith.constant 0 : i32
    %c0_i32_1 = arith.constant 0 : i32
    return %c0_i32, %c0_i32_0 : i32, i32
  }
  func.func @transform_10(%arg0: i32) -> (i32, i32) {
    %c0_i32 = arith.constant 0 : i32
    %c0_i32_0 = arith.constant 0 : i32
    %c0_i32_1 = arith.constant 0 : i32
    return %c0_i32, %c0_i32_0 : i32, i32
  }
  func.func @transform_11(%arg0: i32) -> (i32, i32) {
    %c0_i32 = arith.constant 0 : i32
    %c0_i32_0 = arith.constant 0 : i32
    return %arg0, %c0_i32 : i32, i32
  }
  func.func @transform_12(%arg0: i32) -> (i32, i32) {
    %c0_i32 = arith.constant 0 : i32
    %c0_i32_0 = arith.constant 0 : i32
    return %arg0, %c0_i32 : i32, i32
  }
}

</mosaic_0001>

<bundles_post_ra>
// kernel: tpu_custom_call.1
= control target key start
LH: loop header
LB: loop body
LE: loop exit
PB: predicated region body
PF: predicated region fallthrough
CT: control target
= control target key end

     0   :  { %18 = vsyncpa [#allocation3], 0  ;;  %s1108_s0 = inlined_call_operand.hbm [shape: f32[2,32], index: 0, kind: input, shape index: {}]   ;;  %s1109_s1 = inlined_call_operand.vmem [shape: f32[2,32], index: 1, kind: input, shape index: {}]   ;;  %s1110_s2 = inlined_call_operand.vmem [shape: f32[2,32], index: 2, kind: input, shape index: {}]   ;;  %s1111_s3 = inlined_call_operand.vmem [shape: f32[2,32], index: 3, kind: input, shape index: {}]   ;;  %s1112_s4 = inlined_call_operand.vmem [shape: f32[1,32], index: 4, kind: input, shape index: {}]   ;;  %s1113_s5 = inlined_call_operand.vmem [shape: f32[1,32], index: 5, kind: input, shape index: {}]   ;;  %s1114_s6 = inlined_call_operand.vmem [shape: f32[1,32], index: 6, kind: input, shape index: {}]   ;;  %s1115_s7 = inlined_call_operand.vmem [shape: f32[1,32], index: 7, kind: input, shape index: {}]   ;;  %s1116_s8 = inlined_call_operand.hbm [shape: f32[32,640], index: 8, kind: input, shape index: {}]   ;;  %s1117_s9 = inlined_call_operand.hbm [shape: f32[32,640], index: 9, kind: input, shape index: {}]   ;;  %s1118_s10 = inlined_call_operand.vmem [shape: f32[1,640], index: 10, kind: input, shape index: {}]   ;;  %s1119_s11 = inlined_call_operand.hbm [shape: f32[2,32], index: 11, kind: output, shape index: {0}]   ;;  %s1120_s12 = inlined_call_operand.hbm [shape: f32[2,32], index: 12, kind: output, shape index: {1}]  }
   0x1   :  { %19 = vsyncpa [#allocation6], 0 }
   0x2   :  { %20 = vsyncpa [#allocation4], 0 }
   0x3   :  { %21 = vsyncpa [#allocation10], 0  ;;  %s927_s21 = smov [#allocation5]   ;;  %s809_s25 = scalar_lea.hbm %s1116_s8, 2560 }
   0x4   :  { %s51_s22 = sshll.u32 %s927_s21, 4  ;;  %p810_p0 = scmp.ne.s32.totalorder %s1116_s8, %s809_s25  ;;  %s52_s22 = int_to_ptr.vmem [resolvable:$true] %s51_s22 }
   0x5   :  { %p813_p1 = scmp.lt.u32.totalorder %s809_s25, %s1116_s8 }
   0x7   :  { %p815_p2 = pnand %p813_p1, %p810_p0 }
   0x9   :  { %818 = shalt.err (!%p815_p2)
}
   0xa   :  { %s819_s30 = scalar_lea.vmem %s52_s22, 2560  ;;  %p824_p4 = scmp.lt.s32.totalorder %s52_s22, %s52_s22 }
   0xb   :  { %p820_p3 = scmp.ne.s32.totalorder %s52_s22, %s819_s30  ;;  %p825_p5 = scmp.lt.s32.totalorder %s819_s30, %s819_s30 }
   0xd   :  { %p826_p6 = por %p825_p5, %p824_p4 }
   0xf   :  { %p827_p7 = pnand %p826_p6, %p820_p3 }
  0x11   :  { %830 = shalt.err (!%p827_p7)
}
  0x12   :  { %s928_s13 = smov 640   ;;  %s929_s14 = smov 40  }
  0x13   :  { %57 = dma.hbm_to_vmem [thread:$0]  %s1116_s8, 2560, %s52_s22, [#allocation6], %s928_s13, %s928_s13, %s929_s14  }
  0x14   :  { %s930_s17 = smov [#allocation2]   ;;  %s931_s19 = smov [#allocation7]  }
  0x15   :  { %s28_s18 = sshll.u32 %s930_s17, 4  ;;  %s63_s20 = sshll.u32 %s931_s19, 4  ;;  %s29_s18 = int_to_ptr.vmem [resolvable:$true] %s28_s18  ;;  %s64_s20 = int_to_ptr.vmem [resolvable:$true] %s63_s20 }
  0x16   :  { %s831_s24 = scalar_lea.hbm %s1108_s0, 32 }
  0x17   :  { %p832_p8 = scmp.ne.s32.totalorder %s1108_s0, %s831_s24  ;;  %p835_p9 = scmp.lt.u32.totalorder %s831_s24, %s1108_s0 }
  0x19   :  { %p837_p10 = pnand %p835_p9, %p832_p8 }
  0x1b   :  { %840 = shalt.err (!%p837_p10)
}
  0x1c   :  { %s841_s8 = scalar_lea.vmem %s29_s18, 32  ;;  %p846_p12 = scmp.lt.s32.totalorder %s29_s18, %s29_s18 }
  0x1d   :  { %p842_p11 = scmp.ne.s32.totalorder %s29_s18, %s841_s8  ;;  %p847_p13 = scmp.lt.s32.totalorder %s841_s8, %s841_s8 }
  0x1f   :  { %p848_p0 = por %p847_p13, %p846_p12 }
  0x21   :  { %p849_p1 = pnand %p848_p0, %p842_p11 }
  0x23   :  { %852 = shalt.err (!%p849_p1)
}
  0x24   :  { %31 = dma.hbm_to_vmem [thread:$0]  %s1108_s0, 32, %s29_s18, [#allocation3]  }
  0x25   :  { %s853_s16 = scalar_lea.hbm %s1117_s9, 2560 }
  0x26   :  { %p854_p2 = scmp.ne.s32.totalorder %s1117_s9, %s853_s16  ;;  %p857_p3 = scmp.lt.u32.totalorder %s853_s16, %s1117_s9 }
  0x28   :  { %p859_p4 = pnand %p857_p3, %p854_p2 }
  0x2a   :  { %862 = shalt.err (!%p859_p4)
}
  0x2b   :  { %s863_s24 = scalar_lea.vmem %s64_s20, 2560  ;;  %p868_p6 = scmp.lt.s32.totalorder %s64_s20, %s64_s20 }
  0x2c   :  { %p864_p5 = scmp.ne.s32.totalorder %s64_s20, %s863_s24  ;;  %p869_p7 = scmp.lt.s32.totalorder %s863_s24, %s863_s24 }
  0x2e   :  { %p870_p8 = por %p869_p7, %p868_p6 }
  0x30   :  { %p871_p9 = pnand %p870_p8, %p864_p5 }
  0x32   :  { %874 = shalt.err (!%p871_p9)
}
  0x33   :  { %69 = dma.hbm_to_vmem [thread:$0]  %s1117_s9, 2560, %s64_s20, [#allocation6], %s928_s13, %s928_s13, %s929_s14  }
  0x34   :  { %919 = dma.done.wait [#allocation3], 32  }
  0x35   :  { %920 = vsyncadd [#allocation3], 4294967264 }
  0x36   :  { %921 = dma.done.wait [#allocation6], 5120  }
  0x37   :  { %922 = vsyncadd [#allocation6], 4294962176  ;;  %v932_v0 = vmov 0.0   ;;  %v136_v1 = vld [vmem:[#allocation7 + $0x8] sm:$0xff]  ;;  %v141_v2 = vld [vmem:[#allocation7 + $0x30] sm:$0xff]  ;;  %vm155_vm0 = vcmask 261120  }
  0x38   :  { %294 = vmatprep.mubr.f32.mxu1 %v932_v0  ;;  %223 = vmatprep.mubr.f32.mxu0 %v932_v0  ;;  %v138_v3 = vld [vmem:[#allocation7 + $0x18] sm:$0xff]  ;;  %v731_v4 = vpack.c.bf16 %v141_v2, %v136_v1  ;;  %v143_v5 = vld [vmem:[#allocation7 + $0x40] sm:$0xff]  ;;  %v140_v7 = vld [vmem:[#allocation7 + $0x28] sm:$0xff]  ;;  %v933_v40 = vmov 0.0|0.0   ;;  %vm934_vm1 = vmmov 0   ;;  %s935_s29 = smov [#allocation9]  }
  0x39   :  { %v135_v6 = vld [vmem:[#allocation7] sm:$0xff]  ;;  %v739_v8 = vpack.c.bf16 %v143_v5, %v138_v3  ;;  %v137_v10 = vld [vmem:[#allocation7 + $0x10] sm:$0xff]  ;;  %v142_v11 = vld [vmem:[#allocation7 + $0x38] sm:$0xff]  ;;  %s671_s30 = sshll.u32 %s935_s29, 4  ;;  %vm652_vm2 = vcmask 254976   ;;  %s672_s30 = int_to_ptr.vmem [resolvable:$true] %s671_s30 }
  0x3a   :  { %v733_v9 = vpack.c.bf16 %v140_v7, %v135_v6  ;;  %v146_v12 = vld [vmem:[#allocation7 + $0x58] sm:$0xff]  ;;  %732 = vmatprep.subr.bf16.mxu0 %v731_v4  ;;  %v741_v13 = vpack.c.bf16 %v142_v11, %v137_v10  ;;  %v151_v14 = vld [vmem:[#allocation7 + $0x80] sm:$0xff]  ;;  %v148_v15 = vld [vmem:[#allocation7 + $0x68] sm:$0xff]  ;;  %p880_p11 = scmp.lt.s32.totalorder %s672_s30, %s672_s30 }
  0x3b   :  { %v153_v16 = vld [vmem:[#allocation7 + $0x90] sm:$0xff]  ;;  %740 = vmatprep.subr.bf16.mxu1 %v739_v8  ;;  %v735_v17 = vpack.c.bf16 %v151_v14, %v146_v12  ;;  %v150_v20 = vld [vmem:[#allocation7 + $0x78] sm:$0xff]  ;;  %v147_v21 = vld [vmem:[#allocation7 + $0x60] sm:$0xff] }
  0x3c   :  { %734 = vmatpush1.bf16.msra.mxu0 %v733_v9  ;;  %v743_v18 = vpack.c.bf16 %v153_v16, %v148_v15  ;;  %v145_v19 = vld [vmem:[#allocation7 + $0x50] sm:$0xff]  ;;  %742 = vmatpush1.bf16.msra.mxu1 %v741_v13  ;;  %v152_v23 = vld [vmem:[#allocation7 + $0x88] sm:$0xff]  ;;  %v118_v29 = vld [vmem:[#allocation5 + $0x18] sm:$0xff]  ;;  %v588_v9 = vlaneseq }
  0x3d   :  { %v737_v22 = vpack.c.bf16 %v150_v20, %v145_v19  ;;  %v98_v24 = vld [vmem:[%s1109_s1] sm:$0x3]  ;;  %736 = vmatprep.subr.bf16.mxu0 %v735_v17  ;;  %v745_v26 = vpack.c.bf16 %v152_v23, %v147_v21  ;;  %v123_v30 = vld [vmem:[#allocation5 + $0x40] sm:$0xff]  ;;  %v144_v33 = vld [vmem:[#allocation7 + $0x48] sm:$0xff] }
  0x3e   :  { %v687_v25 = vld [vmem:[%s1114_s6] ss:$0 sm:$0xff]  ;;  %744 = vmatprep.subr.bf16.mxu1 %v743_v18  ;;  %v761_v31 = vpack.c.bf16 %v123_v30, %v118_v29  ;;  %v139_v32 = vld [vmem:[#allocation7 + $0x20] sm:$0xff]  ;;  %v122_v37 = vld [vmem:[#allocation5 + $0x38] sm:$0xff]  ;;  %v589_v10 = vshrl.u32 %v588_v9, 7 }
  0x3f   :  { %v106_v27 = vmul.f32 %v687_v25, %v98_v24  ;;  %v688_v28 = vld [vmem:[%s1115_s7] ss:$0 sm:$0xff]  ;;  %v748_v36 = vpack.c.bf16 %v144_v33, %v139_v32  ;;  %v128_v38 = vld [vmem:[#allocation5 + $0x68] sm:$0xff]  ;;  %v154_v43 = vld [vmem:[#allocation7 + $0x98] sm:$0xff] }
  0x40   :  { %v117_v34 = vld [vmem:[#allocation5 + $0x10] sm:$0xff]  ;;  %738 = vmatpush1.bf16.msra.mxu0 %v737_v22  ;;  %746 = vmatpush1.bf16.msra.mxu1 %v745_v26  ;;  %v127_v44 = vld [vmem:[#allocation5 + $0x60] sm:$0xff]  ;;  %v132_v46 = vld [vmem:[#allocation5 + $0x88] sm:$0xff]  ;;  %v598_v11 = vsub.s32 2, %v589_v10  ;;  %v590_v17 = vsub.s32 0, %v589_v10  ;;  %v594_v19 = vsub.s32 1, %v589_v10 }
  0x41   :  { %v114_v35 = vadd.f32 %v688_v28, %v106_v27  ;;  %v133_v39 = vld [vmem:[#allocation5 + $0x90] sm:$0xff]  ;;  %747 = vmatprep.subr.bf16.mxu0 %v933_v40  ;;  %v763_v41 = vpack.c.bf16 %v122_v37, %v117_v34  ;;  %762 = vmatprep.subr.bf16.mxu1 %v761_v31  ;;  %v116_v47 = vld [vmem:[#allocation5 + $0x8] sm:$0xff]  ;;  %v81_v49 = vld [vmem:[#allocation2] sm:$0x3]  ;;  %v767_v54 = vpack.c.bf16 %v132_v46, %v127_v44  ;;  %v602_v30 = vsub.s32 3, %v589_v10 }
  0x42   :  { %v149_v42 = vld [vmem:[#allocation7 + $0x70] sm:$0xff]  ;;  %v765_v45 = vpack.c.bf16 %v133_v39, %v128_v38  ;;  %v115_v56 = vld [vmem:[#allocation5] sm:$0xff]  ;;  %v120_v57 = vld [vmem:[#allocation5 + $0x28] sm:$0xff]  ;;  %v606_v32 = vsub.s32 4, %v589_v10 }
  0x43   :  { %v121_v48 = vld [vmem:[#allocation5 + $0x30] sm:$0xff]  ;;  %689 = vmatmul.mubr.msk.f32.vlgmr.msra.gmra.mrb[0].mxu0 %vm155_vm0, %v114_v35  ;;  %690 = vmatmul.mubr.msk.f32.vlgmr.msra.gmra.mrb[0].mxu1 %vm155_vm0, %v114_v35  ;;  %v751_v51 = vpack.c.bf16 %v154_v43, %v149_v42  ;;  %v119_v58 = vld [vmem:[#allocation5 + $0x20] sm:$0xff]  ;;  %v124_v59 = vld [vmem:[#allocation5 + $0x48] sm:$0xff]  ;;  %v755_v63 = vpack.c.bf16 %v120_v57, %v115_v56 }
  0x44   :  { %v685_v50 = vld [vmem:[%s1112_s4] ss:$0 sm:$0xff]  ;;  %749 = vmatpush3.bf16.msra.mxu0 %v748_v36  ;;  %764 = vmatpush1.bf16.msra.mxu1 %v763_v41  ;;  %v753_v55 = vpack.c.bf16 %v121_v48, %v116_v47  ;;  %v126_v60 = vld [vmem:[#allocation5 + $0x58] sm:$0xff]  ;;  %v131_v61 = vld [vmem:[#allocation5 + $0x80] sm:$0xff]  ;;  %v770_v1 = vpack.c.bf16 %v124_v59, %v119_v58 }
  0x45   :  { %v89_v52 = vmul.f32 %v685_v50, %v81_v49  ;;  %v686_v53 = vld [vmem:[%s1113_s5] ss:$0 sm:$0xff]  ;;  %750 = vmatprep.subr.bf16.mxu0 %v933_v40  ;;  %766 = vmatprep.subr.bf16.mxu1 %v765_v45  ;;  %v757_v2 = vpack.c.bf16 %v131_v61, %v126_v60  ;;  %v130_v4 = vld [vmem:[#allocation5 + $0x78] sm:$0xff] }
  0x46   :  { %717 = vmatprep.mubr.msk.f32.mxu0 %vm934_vm1, %v932_v0  ;;  %509 = vmatprep.mubr.f32.mxu1 %v932_v0  ;;  %v125_v3 = vld [vmem:[#allocation5 + $0x50] sm:$0xff]  ;;  %v134_v6 = vld [vmem:[#allocation5 + $0x98] sm:$0xff] }
  0x47   :  { %v97_v62 = vadd.f32 %v686_v53, %v89_v52  ;;  %v129_v5 = vld [vmem:[#allocation5 + $0x70] sm:$0xff]  ;;  %v759_v7 = vpack.c.bf16 %v130_v4, %v125_v3 }
  0x48   :  { %752 = vmatpush3.bf16.msra.mxu0 %v751_v51  ;;  %768 = vmatpush1.bf16.msra.mxu1 %v767_v54  ;;  %v773_v8 = vpack.c.bf16 %v134_v6, %v129_v5  ;;  %v586_v12 = vld [vmem:[%s1118_s10] sm:$0x1f] }
  0x49   :  { %754 = vmatprep.subr.bf16.mxu0 %v753_v55  ;;  %769 = vmatprep.subr.bf16.mxu1 %v933_v40  ;;  %v599_v13 = vrot.slane %v586_v12, %v598_v11  ;;  %v591_v21 = vrot.slane %v586_v12, %v590_v17  ;;  %v595_v22 = vrot.slane %v586_v12, %v594_v19  ;;  %v626_v48 = vld [vmem:[%s1111_s3] sm:$0x3]  ;;  %s875_s3 = scalar_lea.vmem %s672_s30, 32 }
  0x4a   :  { %v603_v34 = vrot.slane %v586_v12, %v602_v30  ;;  %v618_v49 = vld [vmem:[%s1110_s2] sm:$0x3]  ;;  %p876_p10 = scmp.ne.s32.totalorder %s672_s30, %s875_s3  ;;  %p881_p12 = scmp.lt.s32.totalorder %s875_s3, %s875_s3 }
  0x4b   :  { %718 = vmatmul.mubr.msk.f32.vlgmr.msra.gmra.mrb[2].mxu0 %vm155_vm0, %v114_v35  ;;  %693 = vmatmul.mubr.msk.f32.vlgmr.msra.gmra.mrb[0].mxu1 %vm155_vm0, %v97_v62  ;;  %v607_v35 = vrot.slane %v586_v12, %v606_v32 }
  0x4c   :  { %756 = vmatpush1.bf16.msra.mxu0 %v755_v63  ;;  %771 = vmatpush3.bf16.msra.mxu1 %v770_v1  ;;  %p882_p13 = por %p881_p12, %p880_p11 }
  0x4d   :  { %758 = vmatprep.subr.bf16.mxu0 %v757_v2  ;;  %772 = vmatprep.subr.bf16.mxu1 %v933_v40 }
  0x4e   :  { %438 = vmatprep.mubr.f32.mxu0 %v932_v0  ;;  %728 = vmatprep.mubr.msk.f32.mxu1 %vm934_vm1, %v932_v0  ;;  %p883_p0 = pnand %p882_p13, %p876_p10 }
  0x50   :  { %760 = vmatpush1.bf16.msra.mxu0 %v759_v7  ;;  %774 = vmatpush3.bf16.msra.mxu1 %v773_v8 }
  0x53   :  { %692 = vmatmul.mubr.msk.f32.vlgmr.msra.gmra.mrb[0].mxu0 %vm155_vm0, %v97_v62  ;;  %729 = vmatmul.mubr.msk.f32.vlgmr.msra.gmra.mrb[2].mxu1 %vm155_vm0, %v97_v62 }
 0x11e   :  { %v367_v14 = vpop.f32.mrb[2].mxu0  ;;  %v511_v15 = vpop.f32.mrb[0].mxu1 }
 0x11f   :  { %v719_v16 = vpop.f32.mrb[3].mxu0  ;;  %v615_v18 = vadd.f32 %v599_v13, %v511_v15  ;;  %v513_v0 = vpop.f32.mrb[1].mxu1 }
 0x120   :  { %v616_v37 = vadd.f32 %v603_v34, %v513_v0 }
 0x121   :  { %v696_v20 = vmul.f32 -1.442695, %v615_v18 }
 0x122   :  { %v698_v41 = vmul.f32 -1.442695, %v616_v37 }
 0x123   :  { %789 = vpow2.f32 %v696_v20 }
 0x126   :  { %v440_v23 = vpop.f32.mrb[0].mxu0  ;;  %v582_v25 = vpop.f32.mrb[2].mxu1 }
 0x127   :  { %v613_v24 = vadd.f32 %v591_v21, %v440_v23  ;;  %v442_v26 = vpop.f32.mrb[1].mxu0  ;;  %v583_v27 = vadd.f32 %v582_v25, %v367_v14  ;;  %v730_v29 = vpop.f32.mrb[3].mxu1 }
 0x128   :  { %v614_v28 = vadd.f32 %v595_v22, %v442_v26 }
 0x129   :  { %v697_v31 = vmul.f32 -1.442695, %v613_v24  ;;  %v617_v38 = vadd.f32 %v607_v35, %v583_v27 }
 0x12a   :  { %v695_v33 = vmul.f32 -1.442695, %v614_v28 }
 0x12b   :  { %791 = vpow2.f32 %v697_v31 }
 0x12c   :  { %793 = vpow2.f32 %v695_v33 }
 0x12d   :  { %v790_v36 = vpop.eup %789  ;;  %795 = vtanh.f32 %v617_v38 }
 0x12e   :  { %v630_v39 = vadd.f32 1.0, %v790_v36 }
 0x130   :  { %797 = vrcp.f32 %v630_v39 }
 0x135   :  { %v792_v40 = vpop.eup %791 }
 0x136   :  { %v638_v42 = vadd.f32 1.0, %v792_v40  ;;  %v794_v43 = vpop.eup %793 }
 0x137   :  { %v622_v44 = vadd.f32 1.0, %v794_v43  ;;  %v796_v45 = vpop.eup %795 }
 0x138   :  { %799 = vrcp.f32 %v638_v42 }
 0x139   :  { %801 = vpow2.f32 %v698_v41 }
 0x13a   :  { %803 = vrcp.f32 %v622_v44  ;;  %v798_v46 = vpop.eup %797 }
 0x13b   :  { %v633_v53 = vmul.f32 %v798_v46, %v626_v48 }
 0x142   :  { %v800_v47 = vpop.eup %799 }
 0x143   :  { %v802_v50 = vpop.eup %801  ;;  %v642_v51 = vmul.f32 %v800_v47, %v796_v45 }
 0x144   :  { %v804_v52 = vpop.eup %803  ;;  %v647_v55 = vadd.f32 1.0, %v802_v50 }
 0x145   :  { %v625_v54 = vmul.f32 %v804_v52, %v618_v49 }
 0x146   :  { %805 = vrcp.f32 %v647_v55 }
 0x147   :  { %v634_v56 = vadd.f32 %v633_v53, %v625_v54 }
 0x149   :  { %v643_v57 = vadd.f32 %v642_v51, %v634_v56 }
 0x14b   :  { %807 = vtanh.f32 %v643_v57  ;;  %654 = vst.msk [vmem:[#allocation9] sm:$0x3] %vm652_vm2, %v643_v57 }
 0x14c   :  { %886 = shalt.err (!%p883_p0)
}
 0x14d   :  { %s887_s16 = scalar_lea.hbm %s1120_s12, 32 }
 0x14e   :  { %p888_p1 = scmp.ne.s32.totalorder %s1120_s12, %s887_s16  ;;  %p891_p2 = scmp.lt.u32.totalorder %s887_s16, %s1120_s12 }
 0x150   :  { %p893_p3 = pnand %p891_p2, %p888_p1 }
 0x152   :  { %896 = shalt.err (!%p893_p3)
}
 0x153   :  { %674 = dma.vmem_to_hbm [thread:$0]  %s672_s30, 32, %s1120_s12, [#allocation10]   ;;  %v806_v58 = vpop.eup %805 }
 0x154   :  { %s936_s18 = smov [#allocation8]  }
 0x155   :  { %s661_s9 = sshll.u32 %s936_s18, 4  ;;  %v808_v59 = vpop.eup %807  ;;  %s662_s9 = int_to_ptr.vmem [resolvable:$true] %s661_s9 }
 0x156   :  { %v651_v60 = vmul.f32 %v808_v59, %v806_v58  ;;  %s897_s13 = scalar_lea.vmem %s662_s9, 32  ;;  %p902_p5 = scmp.lt.s32.totalorder %s662_s9, %s662_s9 }
 0x157   :  { %p898_p4 = scmp.ne.s32.totalorder %s662_s9, %s897_s13  ;;  %p903_p6 = scmp.lt.s32.totalorder %s897_s13, %s897_s13 }
 0x158   :  { %653 = vst.msk [vmem:[#allocation8] sm:$0x3] %vm652_vm2, %v651_v60 }
 0x159   :  { %p904_p7 = por %p903_p6, %p902_p5 }
 0x15b   :  { %p905_p8 = pnand %p904_p7, %p898_p4 }
 0x15d   :  { %908 = shalt.err (!%p905_p8)
}
 0x15e   :  { %s909_s25 = scalar_lea.hbm %s1119_s11, 32 }
 0x15f   :  { %p910_p9 = scmp.ne.s32.totalorder %s1119_s11, %s909_s25  ;;  %p913_p10 = scmp.lt.u32.totalorder %s909_s25, %s1119_s11 }
 0x161   :  { %p915_p11 = pnand %p913_p10, %p910_p9 }
 0x163   :  { %918 = shalt.err (!%p915_p11)
}
 0x164   :  { %664 = dma.vmem_to_hbm [thread:$0]  %s662_s9, 32, %s1119_s11, [#allocation4]  }
 0x165   :  { %923 = dma.done.wait [#allocation4], 32  }
 0x166   :  { %924 = vsyncadd [#allocation4], 4294967264 }
 0x167   :  { %925 = dma.done.wait [#allocation10], 32  }
 0x168   :  { %926 = vsyncadd [#allocation10], 4294967264 }
 0x169   :  { %681 = vsyncpa [#allocation3], 1 }
 0x16a   :  { %682 = vsyncpa [#allocation6], 1 }
 0x16b   :  { %683 = vsyncpa [#allocation4], 1 }
 0x16c   :  { %684 = vsyncpa [#allocation10], 1 }

</bundles_post_ra>
